<compile_context>
chip_gen: v6e
topology: v6e:2x2x1
jax: 0.10.0
libtpu: 0.0.40
codegen_flags: <defaults>
</compile_context>

<pallas_src>
import functools

import jax
import jax.numpy as jnp
from jax.experimental import pallas as pl
from jax.experimental.pallas import tpu as pltpu


# ---------------------------------------------------------------------------
# Fused per-scale kernel: STFT + Conv1d(k=3) + LeakyReLU + 1x1 head
# ---------------------------------------------------------------------------
def _fused_scale_kernel(chunks_ref, dft_ref, w1_ref, b1_ref, w2_ref, b2_ref,
                        o_ref, frames_ref, spec_ref, *,
                        n_frames, hop, b_blk, hidden, c_out):
    F = n_frames
    F_out = F - 2
    H = hidden

    # 1) Frame matrix (n_fft, b_blk*F) bf16 in VMEM scratch. Row q*hop+i of a
    #    frame column is sample q*hop+i of that frame, so the STFT becomes a
    #    single full-depth (K = n_fft) MXU matmul instead of 4 K = hop passes.
    for b in range(b_blk):
        ch = chunks_ref[b]                                   # (hop, n_chunks)
        for q in range(4):
            frames_ref[q * hop:(q + 1) * hop, b * F:(b + 1) * F] = ch[:, q:q + F]

    # 2) STFT: one MXU matmul, f32 accumulation, bf16 spec into VMEM scratch
    #    (the f32 accumulator's live range ends at this cast+store).
    spec_ref[...] = jnp.dot(dft_ref[...], frames_ref[...],
                            preferred_element_type=jnp.float32
                            ).astype(jnp.bfloat16)           # (C_pad, b_blk*F)

    # 3) Conv1d(k=3, valid): one (3H, C_pad) @ (C_pad, b_blk*F) matmul; tap
    #    blocks combined with cheap shifted slices of the small result.
    g = jnp.dot(w1_ref[...], spec_ref[...],
                preferred_element_type=jnp.float32)          # (3H, b_blk*F)

    for b in range(b_blk):
        s = b * F
        h = (g[0:H,     s:s + F_out]
             + g[H:2 * H,   s + 1:s + 1 + F_out]
             + g[2 * H:3 * H, s + 2:s + 2 + F_out]
             + b1_ref[...])                                  # (H, F_out) f32
        h = jnp.where(h > 0, h, 0.2 * h)                     # LeakyReLU(0.2)

        # 4) 1x1 head: VPU broadcast-multiply + sublane reduce over H
        #    (skips an M=1 MXU matmul; bias add stays in f32).
        rows = [jnp.sum(w2_ref[:, c:c + 1] * h, axis=0, keepdims=True)
                + b2_ref[c:c + 1, :]
                for c in range(c_out)]
        o_ref[b] = rows[0] if c_out == 1 else jnp.concatenate(rows, axis=0)


def _choose_batch_block(B, F):
    """Batch elements per grid step: aim for >=128 matmul lanes, but keep at
    least 2 grid steps when B allows (dual-TensorCore v7x)."""
    target = max(1, -(-128 // F))
    b_blk = min(B, target)
    if B >= 2:
        b_blk = min(b_blk, B // 2)
    b_blk = max(b_blk, 1)
    while B % b_blk:
        b_blk -= 1
    return b_blk


def scale_forward_pallas(x, n_fft, operands):
    dft_t, w1s, b1c, w2c, b2c = operands
    B, _, T = x.shape
    hop = n_fft // 4
    C_pad = dft_t.shape[0]
    F = (T - n_fft) // hop + 1
    F_out = F - 2
    n_chunks = F + 3                       # frames 0..F-1 touch chunks f..f+3
    hidden = w1s.shape[0] // 3
    c_out = w2c.shape[1]

    b_blk = _choose_batch_block(B, F)
    n_steps = B // b_blk
    lanes = b_blk * F

    # Cast to bf16 FIRST (halves the transpose's HBM traffic), then view the
    # signal as hop-sized chunks with frames on lanes: (B, hop, n_chunks).
    sig = x[:, 0, :n_chunks * hop].astype(jnp.bfloat16)
    chunks_t = sig.reshape(B, n_chunks, hop).transpose(0, 2, 1)

    kernel = functools.partial(_fused_scale_kernel, n_frames=F, hop=hop,
                               b_blk=b_blk, hidden=hidden, c_out=c_out)

    # Explicit VMEM budget (bytes) with headroom, capped at v7x's 64 MiB.
    needed = (
        2 * b_blk * hop * n_chunks * 2            # input chunks, 2 buffers
        + C_pad * n_fft * 2                       # DFT (Buffered(1))
        + 3 * hidden * C_pad * 2                  # conv1 taps (Buffered(1))
        + (hidden + hidden * c_out + c_out) * 4   # biases / head weights
        + 2 * b_blk * c_out * F_out * 4           # output, 2 buffers
        + n_fft * lanes * 2 + C_pad * lanes * 2   # frames / spec scratch
        + 3 * hidden * lanes * 4                  # f32 conv result headroom
    )
    vmem_limit = int(min(64 * 1024 * 1024, max(32 * 1024 * 1024, 1.5 * needed)))

    return pl.pallas_call(
        kernel,
        out_shape=jax.ShapeDtypeStruct((B, c_out, F_out), jnp.float32),
        grid=(n_steps,),
        in_specs=[
            pl.BlockSpec((b_blk, hop, n_chunks), lambda i: (i, 0, 0)),
            # Grid-invariant operands: constant index_map + single buffer.
            pl.BlockSpec((C_pad, n_fft), lambda i: (0, 0),
                         pipeline_mode=pl.Buffered(1)),
            pl.BlockSpec((3 * hidden, C_pad), lambda i: (0, 0),
                         pipeline_mode=pl.Buffered(1)),
            pl.BlockSpec((hidden, 1), lambda i: (0, 0),
                         pipeline_mode=pl.Buffered(1)),
            pl.BlockSpec((hidden, c_out), lambda i: (0, 0),
                         pipeline_mode=pl.Buffered(1)),
            pl.BlockSpec((c_out, 1), lambda i: (0, 0),
                         pipeline_mode=pl.Buffered(1)),
        ],
        out_specs=pl.BlockSpec((b_blk, c_out, F_out), lambda i: (i, 0, 0)),
        scratch_shapes=[
            pltpu.VMEM((n_fft, lanes), jnp.bfloat16),   # frame matrix
            pltpu.VMEM((C_pad, lanes), jnp.bfloat16),   # bf16 spectrogram
        ],
        compiler_params=pltpu.CompilerParams(
            dimension_semantics=("parallel",),          # shard batch on v7x TCs
            vmem_limit_bytes=vmem_limit),
    )(chunks_t, dft_t, w1s, b1c, w2c, b2c)


# ---------------------------------------------------------------------------
# Precomputed operands (hoisted off the forward's critical path)
# ---------------------------------------------------------------------------
def window_folded_dft(n_fft):
    """(n_fft, n_fft+2) matrix: [real | imag] one-sided DFT with periodic hann
    window and torchaudio `normalized=True` (1/||window||_2) folded in."""
    k = jnp.arange(n_fft, dtype=jnp.float32)
    hann = 0.5 * (1.0 - jnp.cos(2.0 * jnp.pi * k / n_fft))
    norm = jnp.sqrt(jnp.sum(hann ** 2))
    freqs = jnp.arange(n_fft // 2 + 1, dtype=jnp.float32)
    ang = 2.0 * jnp.pi * k[:, None] * freqs[None, :] / n_fft
    win = (hann / norm)[:, None]
    return jnp.concatenate([jnp.cos(ang) * win, -jnp.sin(ang) * win], axis=1)


def prepare_scale_operands(n_fft, params):
    assert n_fft % 4 == 0
    C = n_fft + 2
    C_pad = ((C + 7) // 8) * 8            # full sublane tiles on every operand
    w1, b1, w2, b2 = params               # (H,C,3), (H,), (co,H,1), (co,)
    hidden = w1.shape[0]
    c_out = w2.shape[0]

    # (C_pad, n_fft) window-folded DFT, zero rows for the channel padding.
    dft = window_folded_dft(n_fft)                             # (n_fft, C)
    dft_t = jnp.zeros((C_pad, n_fft), jnp.float32).at[:C, :].set(dft.T)

    # Conv1 taps stacked on rows: rows [k*H:(k+1)*H] = tap k; C padded to C_pad.
    w1s = jnp.zeros((3 * hidden, C_pad), jnp.float32)
    for k in range(3):
        w1s = w1s.at[k * hidden:(k + 1) * hidden, :C].set(w1[:, :, k])

    b1c = b1.reshape(hidden, 1)                                # (H, 1)   f32
    w2c = w2[:, :, 0].T                                        # (H, co)  f32
    b2c = b2.reshape(c_out, 1)                                 # (co, 1)  f32
    return (dft_t.astype(jnp.bfloat16), w1s.astype(jnp.bfloat16),
            b1c, w2c, b2c)


def make_convnet_params(key, in_channels, hidden, out_channels):
    k1, k2, k3, k4 = jax.random.split(key, 4)
    w1 = jax.random.normal(k1, (hidden, in_channels, 3), jnp.float32) * 0.05
    b1 = jax.random.normal(k2, (hidden,), jnp.float32) * 0.05
    w2 = jax.random.normal(k3, (out_channels, hidden, 1), jnp.float32) * 0.05
    b2 = jax.random.normal(k4, (out_channels,), jnp.float32) * 0.05
    return w1, b1, w2, b2


def multiscale_spectral_discriminator(x, scales, prepared):
    """Pallas forward: returns a list of features (B, C_out, F-2), one per scale."""
    return [scale_forward_pallas(x, n, prepared[n]) for n in scales]


# ---------------------------------------------------------------------------
# Pure-JAX f32 reference (direct framing / direct conv) for verification
# ---------------------------------------------------------------------------
def multiscale_spectral_discriminator_ref(x, scales, params):
    feats = []
    B, _, T = x.shape
    for n in scales:
        hop = n // 4
        F = (T - n) // hop + 1
        F_out = F - 2
        idx = jnp.arange(F)[:, None] * hop + jnp.arange(n)[None, :]
        frames = x[:, 0, :][:, idx]                               # (B, F, n)
        spec = jnp.einsum('bfk,kc->bcf', frames, window_folded_dft(n))
        w1, b1, w2, b2 = params[n]
        h = sum(jnp.einsum('bcf,hc->bhf', spec[:, :, k:k + F_out], w1[:, :, k])
                for k in range(3))
        h = h + b1[None, :, None]
        h = jnp.where(h > 0, h, 0.2 * h)
        out = jnp.einsum('bhf,oh->bof', h, w2[:, :, 0]) + b2[None, :, None]
        feats.append(out)
    return feats


if __name__ == "__main__":
    key = jax.random.PRNGKey(0)
    kx, kp1, kp2 = jax.random.split(key, 3)

    B, T = 4, 512
    scales = (64, 128)
    hidden = 32
    n_channels = 1

    x = jax.random.normal(kx, (B, n_channels, T), jnp.float32)
    params = {
        64: make_convnet_params(kp1, 64 + 2, hidden, n_channels),
        128: make_convnet_params(kp2, 128 + 2, hidden, n_channels),
    }
    prepared = {n: prepare_scale_operands(n, params[n]) for n in scales}

    feats = multiscale_spectral_discriminator(x, scales, prepared)
    feats = [jax.block_until_ready(f) for f in feats]

    refs = multiscale_spectral_discriminator_ref(x, scales, params)
    for n, f, r in zip(scales, feats, refs):
        assert f.shape == r.shape, (n, f.shape, r.shape)
        # bf16 MXU operands (f32 accumulation) vs the pure f32 reference.
        assert jnp.allclose(f, r, atol=3e-2, rtol=3e-2), f"mismatch at scale {n}"

    print("KERNEL_OK")
</pallas_src>

<mosaic_0001>
module attributes {stable_mosaic.version = 11 : i64} {
  func.func @_fused_scale_kernel(%arg0: i32, %arg1: memref<2x16x32xbf16, #tpu.memory_space<vmem>>, %arg2: memref<72x64xbf16, #tpu.memory_space<vmem>>, %arg3: memref<96x72xbf16, #tpu.memory_space<vmem>>, %arg4: memref<32x1xf32, #tpu.memory_space<vmem>>, %arg5: memref<32x1xf32, #tpu.memory_space<vmem>>, %arg6: memref<1x1xf32, #tpu.memory_space<vmem>>, %arg7: memref<2x1x27xf32, #tpu.memory_space<vmem>>, %arg8: memref<64x58xbf16, #tpu.memory_space<vmem>>, %arg9: memref<72x58xbf16, #tpu.memory_space<vmem>>) attributes {dimension_semantics = [#tpu.dimension_semantics<parallel>], iteration_bounds = array<i64: 2>, scalar_prefetch = 0 : i64, scratch_operands = 2 : i64, tpu.core_type = #tpu.core_type<tc>, window_params = [{transform_indices = @transform_0, window_bounds = array<i64: 2, 16, 32>}, {pipeline_mode = #tpu.pipeline_mode<synchronous>, transform_indices = @transform_1, window_bounds = array<i64: 72, 64>}, {pipeline_mode = #tpu.pipeline_mode<synchronous>, transform_indices = @transform_2, window_bounds = array<i64: 96, 72>}, {pipeline_mode = #tpu.pipeline_mode<synchronous>, transform_indices = @transform_3, window_bounds = array<i64: 32, 1>}, {pipeline_mode = #tpu.pipeline_mode<synchronous>, transform_indices = @transform_4, window_bounds = array<i64: 32, 1>}, {pipeline_mode = #tpu.pipeline_mode<synchronous>, transform_indices = @transform_5, window_bounds = array<i64: 1, 1>}, {transform_indices = @transform_6, window_bounds = array<i64: 2, 1, 27>}]} {
    %c0 = arith.constant 0 : index
    %c0_0 = arith.constant 0 : index
    %c0_1 = arith.constant 0 : index
    %0 = vector.load %arg1[%c0, %c0_0, %c0_1] : memref<2x16x32xbf16, #tpu.memory_space<vmem>>, vector<1x16x32xbf16>
    %1 = vector.shape_cast %0 : vector<1x16x32xbf16> to vector<16x32xbf16>
    %2 = vector.extract_strided_slice %1 {offsets = [0, 0], sizes = [16, 29], strides = [1, 1]} : vector<16x32xbf16> to vector<16x29xbf16>
    %c0_2 = arith.constant 0 : index
    %c0_3 = arith.constant 0 : index
    %3 = vector.load %arg8[%c0_2, %c0_3] : memref<64x58xbf16, #tpu.memory_space<vmem>>, vector<16x29xbf16>
    tpu.vector_store %arg8[%c0_2, %c0_3], %2 {strides = array<i32>} : memref<64x58xbf16, #tpu.memory_space<vmem>>, vector<16x29xbf16>,
    %4 = vector.extract_strided_slice %1 {offsets = [0, 1], sizes = [16, 29], strides = [1, 1]} : vector<16x32xbf16> to vector<16x29xbf16>
    %c16 = arith.constant 16 : index
    %c0_4 = arith.constant 0 : index
    %5 = vector.load %arg8[%c16, %c0_4] : memref<64x58xbf16, #tpu.memory_space<vmem>>, vector<16x29xbf16>
    tpu.vector_store %arg8[%c16, %c0_4], %4 {strides = array<i32>} : memref<64x58xbf16, #tpu.memory_space<vmem>>, vector<16x29xbf16>,
    %6 = vector.extract_strided_slice %1 {offsets = [0, 2], sizes = [16, 29], strides = [1, 1]} : vector<16x32xbf16> to vector<16x29xbf16>
    %c32 = arith.constant 32 : index
    %c0_5 = arith.constant 0 : index
    %7 = vector.load %arg8[%c32, %c0_5] : memref<64x58xbf16, #tpu.memory_space<vmem>>, vector<16x29xbf16>
    tpu.vector_store %arg8[%c32, %c0_5], %6 {strides = array<i32>} : memref<64x58xbf16, #tpu.memory_space<vmem>>, vector<16x29xbf16>,
    %8 = vector.extract_strided_slice %1 {offsets = [0, 3], sizes = [16, 29], strides = [1, 1]} : vector<16x32xbf16> to vector<16x29xbf16>
    %c48 = arith.constant 48 : index
    %c0_6 = arith.constant 0 : index
    %9 = vector.load %arg8[%c48, %c0_6] : memref<64x58xbf16, #tpu.memory_space<vmem>>, vector<16x29xbf16>
    tpu.vector_store %arg8[%c48, %c0_6], %8 {strides = array<i32>} : memref<64x58xbf16, #tpu.memory_space<vmem>>, vector<16x29xbf16>,
    %c1 = arith.constant 1 : index
    %c0_7 = arith.constant 0 : index
    %c0_8 = arith.constant 0 : index
    %10 = vector.load %arg1[%c1, %c0_7, %c0_8] : memref<2x16x32xbf16, #tpu.memory_space<vmem>>, vector<1x16x32xbf16>
    %11 = vector.shape_cast %10 : vector<1x16x32xbf16> to vector<16x32xbf16>
    %12 = vector.extract_strided_slice %11 {offsets = [0, 0], sizes = [16, 29], strides = [1, 1]} : vector<16x32xbf16> to vector<16x29xbf16>
    %c0_9 = arith.constant 0 : index
    %c29 = arith.constant 29 : index
    %13 = vector.load %arg8[%c0_9, %c29] : memref<64x58xbf16, #tpu.memory_space<vmem>>, vector<16x29xbf16>
    tpu.vector_store %arg8[%c0_9, %c29], %12 {strides = array<i32>} : memref<64x58xbf16, #tpu.memory_space<vmem>>, vector<16x29xbf16>,
    %14 = vector.extract_strided_slice %11 {offsets = [0, 1], sizes = [16, 29], strides = [1, 1]} : vector<16x32xbf16> to vector<16x29xbf16>
    %c16_10 = arith.constant 16 : index
    %c29_11 = arith.constant 29 : index
    %15 = vector.load %arg8[%c16_10, %c29_11] : memref<64x58xbf16, #tpu.memory_space<vmem>>, vector<16x29xbf16>
    tpu.vector_store %arg8[%c16_10, %c29_11], %14 {strides = array<i32>} : memref<64x58xbf16, #tpu.memory_space<vmem>>, vector<16x29xbf16>,
    %16 = vector.extract_strided_slice %11 {offsets = [0, 2], sizes = [16, 29], strides = [1, 1]} : vector<16x32xbf16> to vector<16x29xbf16>
    %c32_12 = arith.constant 32 : index
    %c29_13 = arith.constant 29 : index
    %17 = vector.load %arg8[%c32_12, %c29_13] : memref<64x58xbf16, #tpu.memory_space<vmem>>, vector<16x29xbf16>
    tpu.vector_store %arg8[%c32_12, %c29_13], %16 {strides = array<i32>} : memref<64x58xbf16, #tpu.memory_space<vmem>>, vector<16x29xbf16>,
    %18 = vector.extract_strided_slice %11 {offsets = [0, 3], sizes = [16, 29], strides = [1, 1]} : vector<16x32xbf16> to vector<16x29xbf16>
    %c48_14 = arith.constant 48 : index
    %c29_15 = arith.constant 29 : index
    %19 = vector.load %arg8[%c48_14, %c29_15] : memref<64x58xbf16, #tpu.memory_space<vmem>>, vector<16x29xbf16>
    tpu.vector_store %arg8[%c48_14, %c29_15], %18 {strides = array<i32>} : memref<64x58xbf16, #tpu.memory_space<vmem>>, vector<16x29xbf16>,
    %c0_16 = arith.constant 0 : index
    %c0_17 = arith.constant 0 : index
    %20 = vector.load %arg2[%c0_16, %c0_17] : memref<72x64xbf16, #tpu.memory_space<vmem>>, vector<72x64xbf16>
    %c0_18 = arith.constant 0 : index
    %c0_19 = arith.constant 0 : index
    %21 = vector.load %arg8[%c0_18, %c0_19] : memref<64x58xbf16, #tpu.memory_space<vmem>>, vector<64x58xbf16>
    %cst = arith.constant dense<0.000000e+00> : vector<72x58xf32>
    %22 = tpu.matmul %20, %21, %cst {dimension_numbers = #tpu.dot_dimension_numbers<[1], [0], [0], [1], [0, 0, 1, 1], [], []>} : vector<72x64xbf16>, vector<64x58xbf16>, vector<72x58xf32> -> vector<72x58xf32>
    %23 = arith.truncf %22 : vector<72x58xf32> to vector<72x58xbf16>
    %c0_20 = arith.constant 0 : index
    %c0_21 = arith.constant 0 : index
    %24 = vector.load %arg9[%c0_20, %c0_21] : memref<72x58xbf16, #tpu.memory_space<vmem>>, vector<72x58xbf16>
    tpu.vector_store %arg9[%c0_20, %c0_21], %23 {strides = array<i32>} : memref<72x58xbf16, #tpu.memory_space<vmem>>, vector<72x58xbf16>,
    %c0_22 = arith.constant 0 : index
    %c0_23 = arith.constant 0 : index
    %25 = vector.load %arg3[%c0_22, %c0_23] : memref<96x72xbf16, #tpu.memory_space<vmem>>, vector<96x72xbf16>
    %c0_24 = arith.constant 0 : index
    %c0_25 = arith.constant 0 : index
    %26 = vector.load %arg9[%c0_24, %c0_25] : memref<72x58xbf16, #tpu.memory_space<vmem>>, vector<72x58xbf16>
    %cst_26 = arith.constant dense<0.000000e+00> : vector<96x58xf32>
    %27 = tpu.matmul %25, %26, %cst_26 {dimension_numbers = #tpu.dot_dimension_numbers<[1], [0], [0], [1], [0, 0, 1, 1], [], []>} : vector<96x72xbf16>, vector<72x58xbf16>, vector<96x58xf32> -> vector<96x58xf32>
    %28 = vector.extract_strided_slice %27 {offsets = [0, 0], sizes = [32, 27], strides = [1, 1]} : vector<96x58xf32> to vector<32x27xf32>
    %29 = vector.extract_strided_slice %27 {offsets = [32, 1], sizes = [32, 27], strides = [1, 1]} : vector<96x58xf32> to vector<32x27xf32>
    %30 = arith.addf %28, %29 : vector<32x27xf32>
    %31 = vector.extract_strided_slice %27 {offsets = [64, 2], sizes = [32, 27], strides = [1, 1]} : vector<96x58xf32> to vector<32x27xf32>
    %32 = arith.addf %30, %31 : vector<32x27xf32>
    %c0_27 = arith.constant 0 : index
    %c0_28 = arith.constant 0 : index
    %33 = vector.load %arg4[%c0_27, %c0_28] : memref<32x1xf32, #tpu.memory_space<vmem>>, vector<32x1xf32>
    %34 = vector.broadcast %33 : vector<32x1xf32> to vector<32x27xf32>
    %35 = arith.addf %32, %34 : vector<32x27xf32>
    %cst_29 = arith.constant 0.000000e+00 : f32
    %36 = vector.broadcast %cst_29 : f32 to vector<32x27xf32>
    %37 = arith.cmpf ogt, %35, %36 : vector<32x27xf32>
    %cst_30 = arith.constant 2.000000e-01 : f32
    %38 = vector.broadcast %cst_30 : f32 to vector<32x27xf32>
    %39 = arith.mulf %38, %35 : vector<32x27xf32>
    %40 = arith.select %37, %35, %39 : vector<32x27xi1>, vector<32x27xf32>
    %c0_31 = arith.constant 0 : index
    %c0_32 = arith.constant 0 : index
    %41 = vector.load %arg5[%c0_31, %c0_32] : memref<32x1xf32, #tpu.memory_space<vmem>>, vector<32x1xf32>
    %42 = vector.broadcast %41 : vector<32x1xf32> to vector<32x27xf32>
    %43 = arith.mulf %42, %40 : vector<32x27xf32>
    %cst_33 = arith.constant dense<0.000000e+00> : vector<27xf32>
    %44 = vector.multi_reduction <add>, %43, %cst_33 [0] : vector<32x27xf32> to vector<27xf32>
    %45 = vector.shape_cast %44 : vector<27xf32> to vector<1x27xf32>
    %c0_34 = arith.constant 0 : index
    %c0_35 = arith.constant 0 : index
    %46 = vector.load %arg6[%c0_34, %c0_35] : memref<1x1xf32, #tpu.memory_space<vmem>>, vector<1x1xf32>
    %47 = vector.broadcast %46 : vector<1x1xf32> to vector<1x27xf32>
    %48 = arith.addf %45, %47 : vector<1x27xf32>
    %c0_36 = arith.constant 0 : index
    %c0_37 = arith.constant 0 : index
    %c0_38 = arith.constant 0 : index
    %49 = vector.load %arg7[%c0_36, %c0_37, %c0_38] : memref<2x1x27xf32, #tpu.memory_space<vmem>>, vector<1x1x27xf32>
    %50 = vector.shape_cast %49 : vector<1x1x27xf32> to vector<1x27xf32>
    %51 = vector.shape_cast %48 : vector<1x27xf32> to vector<1x1x27xf32>
    tpu.vector_store %arg7[%c0_36, %c0_37, %c0_38], %51 {strides = array<i32>} : memref<2x1x27xf32, #tpu.memory_space<vmem>>, vector<1x1x27xf32>,
    %52 = vector.extract_strided_slice %27 {offsets = [0, 29], sizes = [32, 27], strides = [1, 1]} : vector<96x58xf32> to vector<32x27xf32>
    %53 = vector.extract_strided_slice %27 {offsets = [32, 30], sizes = [32, 27], strides = [1, 1]} : vector<96x58xf32> to vector<32x27xf32>
    %54 = arith.addf %52, %53 : vector<32x27xf32>
    %55 = vector.extract_strided_slice %27 {offsets = [64, 31], sizes = [32, 27], strides = [1, 1]} : vector<96x58xf32> to vector<32x27xf32>
    %56 = arith.addf %54, %55 : vector<32x27xf32>
    %c0_39 = arith.constant 0 : index
    %c0_40 = arith.constant 0 : index
    %57 = vector.load %arg4[%c0_39, %c0_40] : memref<32x1xf32, #tpu.memory_space<vmem>>, vector<32x1xf32>
    %58 = vector.broadcast %57 : vector<32x1xf32> to vector<32x27xf32>
    %59 = arith.addf %56, %58 : vector<32x27xf32>
    %cst_41 = arith.constant 0.000000e+00 : f32
    %60 = vector.broadcast %cst_41 : f32 to vector<32x27xf32>
    %61 = arith.cmpf ogt, %59, %60 : vector<32x27xf32>
    %cst_42 = arith.constant 2.000000e-01 : f32
    %62 = vector.broadcast %cst_42 : f32 to vector<32x27xf32>
    %63 = arith.mulf %62, %59 : vector<32x27xf32>
    %64 = arith.select %61, %59, %63 : vector<32x27xi1>, vector<32x27xf32>
    %c0_43 = arith.constant 0 : index
    %c0_44 = arith.constant 0 : index
    %65 = vector.load %arg5[%c0_43, %c0_44] : memref<32x1xf32, #tpu.memory_space<vmem>>, vector<32x1xf32>
    %66 = vector.broadcast %65 : vector<32x1xf32> to vector<32x27xf32>
    %67 = arith.mulf %66, %64 : vector<32x27xf32>
    %cst_45 = arith.constant dense<0.000000e+00> : vector<27xf32>
    %68 = vector.multi_reduction <add>, %67, %cst_45 [0] : vector<32x27xf32> to vector<27xf32>
    %69 = vector.shape_cast %68 : vector<27xf32> to vector<1x27xf32>
    %c0_46 = arith.constant 0 : index
    %c0_47 = arith.constant 0 : index
    %70 = vector.load %arg6[%c0_46, %c0_47] : memref<1x1xf32, #tpu.memory_space<vmem>>, vector<1x1xf32>
    %71 = vector.broadcast %70 : vector<1x1xf32> to vector<1x27xf32>
    %72 = arith.addf %69, %71 : vector<1x27xf32>
    %c1_48 = arith.constant 1 : index
    %c0_49 = arith.constant 0 : index
    %c0_50 = arith.constant 0 : index
    %73 = vector.load %arg7[%c1_48, %c0_49, %c0_50] : memref<2x1x27xf32, #tpu.memory_space<vmem>>, vector<1x1x27xf32>
    %74 = vector.shape_cast %73 : vector<1x1x27xf32> to vector<1x27xf32>
    %75 = vector.shape_cast %72 : vector<1x27xf32> to vector<1x1x27xf32>
    tpu.vector_store %arg7[%c1_48, %c0_49, %c0_50], %75 {strides = array<i32>} : memref<2x1x27xf32, #tpu.memory_space<vmem>>, vector<1x1x27xf32>,
    return
  }
  func.func @transform_0(%arg0: i32) -> (i32, i32, i32) {
    %c0_i32 = arith.constant 0 : i32
    %c0_i32_0 = arith.constant 0 : i32
    %c0_i32_1 = arith.constant 0 : i32
    return %arg0, %c0_i32, %c0_i32_0 : i32, i32, i32
  }
  func.func @transform_1(%arg0: i32) -> (i32, i32) {
    %c0_i32 = arith.constant 0 : i32
    %c0_i32_0 = arith.constant 0 : i32
    %c0_i32_1 = arith.constant 0 : i32
    return %c0_i32, %c0_i32_0 : i32, i32
  }
  func.func @transform_2(%arg0: i32) -> (i32, i32) {
    %c0_i32 = arith.constant 0 : i32
    %c0_i32_0 = arith.constant 0 : i32
    %c0_i32_1 = arith.constant 0 : i32
    return %c0_i32, %c0_i32_0 : i32, i32
  }
  func.func @transform_3(%arg0: i32) -> (i32, i32) {
    %c0_i32 = arith.constant 0 : i32
    %c0_i32_0 = arith.constant 0 : i32
    %c0_i32_1 = arith.constant 0 : i32
    return %c0_i32, %c0_i32_0 : i32, i32
  }
  func.func @transform_4(%arg0: i32) -> (i32, i32) {
    %c0_i32 = arith.constant 0 : i32
    %c0_i32_0 = arith.constant 0 : i32
    %c0_i32_1 = arith.constant 0 : i32
    return %c0_i32, %c0_i32_0 : i32, i32
  }
  func.func @transform_5(%arg0: i32) -> (i32, i32) {
    %c0_i32 = arith.constant 0 : i32
    %c0_i32_0 = arith.constant 0 : i32
    %c0_i32_1 = arith.constant 0 : i32
    return %c0_i32, %c0_i32_0 : i32, i32
  }
  func.func @transform_6(%arg0: i32) -> (i32, i32, i32) {
    %c0_i32 = arith.constant 0 : i32
    %c0_i32_0 = arith.constant 0 : i32
    %c0_i32_1 = arith.constant 0 : i32
    return %arg0, %c0_i32, %c0_i32_0 : i32, i32, i32
  }
}

</mosaic_0001>

<bundles_post_ra>
// kernel: tpu_custom_call.1
= control target key start
LH: loop header
LB: loop body
LE: loop exit
PB: predicated region body
PF: predicated region fallthrough
CT: control target
= control target key end

     0   :  { %s1588_s0 = inlined_call_operand.vmem [shape: bf16[4,16,32], index: 0, kind: input, shape index: {}]   ;;  %s1589_s1 = inlined_call_operand.vmem [shape: bf16[72,64], index: 1, kind: input, shape index: {}]   ;;  %s1590_s2 = inlined_call_operand.vmem [shape: bf16[96,72], index: 2, kind: input, shape index: {}]   ;;  %s1591_s3 = inlined_call_operand.vmem [shape: f32[32,1], index: 3, kind: input, shape index: {}]   ;;  %s1592_s4 = inlined_call_operand.vmem [shape: f32[32,1], index: 4, kind: input, shape index: {}]   ;;  %s1593_s5 = inlined_call_operand.<no memory space> [shape: f32[1,1], index: 5, kind: input, shape index: {}]   ;;  %s1594_s6 = inlined_call_operand.hbm [shape: f32[4,1,27], index: 6, kind: output, shape index: {}]  }
   0x1   :  { %v11_v0 = vstv %s1593_s5 }
   0x2   :  { %12 = vst [vmem:[#allocation4] sm:$0x1] %v11_v0 }
   0x3   :  { %13 = vsyncpa [#allocation6], 0 }
   0x4   :  { %15 = vsyncpa [#allocation6 + $0x1], 0  ;;  %s1345_s23 = smov 0   ;;  %s1347_s24 = smov 0  }
   0x5   :  { %s1349_s25 = smov 0   ;;  %s1351_s26 = smov 0  }
   0x6 LB: > { %s1366_s5 = sadd.s32 4294967295, %s1291_s26   ;;  %s1019_s27 = sadd.s32 4294967294, %s1291_s26   ;;  %s1291_s26 = sphi %s1351_s26, %s1600_s26   ;;  %s1287_s25 = sphi %s1349_s25, %s1599_s25   ;;  %s1283_s24 = sphi %s1347_s24, %s1598_s24   ;;  %s1279_s23 = sphi %s1345_s23, %s1597_s23  }
   0x7   : > { %s1370_s28 = sadd.s32 1, %s1291_s26   ;;  %s159_s29 = sadd.s32 1, %s1287_s25 }
   0x8   : > { %s156_s30 = ssub.s32 %s1291_s26, %s1370_s28  ;;  %p169_p0 = scmp.ne.s32.totalorder %s1287_s25, %s1283_s24 }
   0x9   : > { %p157_p1 = scmp.eq.s32.totalorder %s156_s30, 0  ;;  %p170_p2 = scmp.eq.s32.totalorder %s1366_s5, 1 }
   0xa   : > { %p175_p3 = scmp.ne.s32.totalorder %s1283_s24, %s1279_s23  ;;  %p176_p4 = scmp.eq.s32.totalorder %s1019_s27, 1 }
   0xb   : > { %s1381_s7 = scalar_select %p157_p1, %s1287_s25, %s159_s29  }
   0xc   : > { %p1383_p5 = por %p170_p2, %p169_p0  ;;  %p1387_p6 = por %p176_p4, %p175_p3 }
   0xd   : > { %p1022_p7 = scmp.ge.s32.totalorder %s1291_s26, 1  ;;  %p219_p8 = scmp.lt.s32.totalorder %s1291_s26, 3 }
   0xf   : > { %p220_p9 = pnand %p1022_p7, %p219_p8 }
  0x10   : > { %s1024_s10 = sshll.u32 (!%p220_p9), %s1366_s5, 1  ;;  %s1293_s15 = smov (!%p220_p9), 26  }
  0x11   : > { %223 = sbr.rel (%p220_p9) target bundleno = 926 (0x39e), region = 44  ;;  %p251_p10 = scmp.lt.s32.totalorder (!%p220_p9), %s1024_s10, 3 }
  0x12   : > { %s1294_s16 = smov (!%p220_p9), 125   ;;  %s1296_s17 = smov (!%p220_p9), 126  }
  0x13   : > { %s1297_s18 = smov (!%p220_p9), 27   ;;  %s1298_s19 = smov (!%p220_p9), 127  }
  0x14   : > { %s1299_s20 = smov (!%p220_p9), 28   ;;  %s1301_s21 = smov (!%p220_p9), 29  }
  0x16   : > { %s1602_s10 = smov (!%p251_p10, %s1024_s10), 3  ;;  %vm261_vm0 = vcmask 232448   ;;  %v1295_v5 = vmov 0.0   ;;  %vm1300_vm1 = vmmov 0   ;;  %vm301_vm2 = vcmask 470248   ;;  %v1215_v24 = vld [vmem:[%s1589_s1] sm:$0xff]  }
  0x17   : > { %s1075_s11 = sshll.u32 %s1602_s10, 3  ;;  %1106 = vmatprep.subr.bf16.mxu0 %v1295_v5  ;;  %1114 = vmatprep.mubr.msk.bf16.mxu0 %vm1300_vm1, %v1295_v5  ;;  %vm392_vm3 = vcmask 523264   ;;  %v1216_v25 = vld [vmem:[%s1589_s1 + $0x8] sm:$0xff]   ;;  %v1217_v26 = vld [vmem:[%s1589_s1 + $0x10] sm:$0xff]   ;;  %v1218_v27 = vld [vmem:[%s1589_s1 + $0x18] sm:$0xff]   ;;  %vm605_vm4 = vcmask 588800  }
  0x18   : > { %s255_s14 = scalar_lea.vmem %s1588_s0, %s1075_s11  ;;  %v1219_v28 = vld [vmem:[%s1589_s1 + $0x20] ss:$0 sps:$4 sm:$0xff]   ;;  %v1453_v30 = vld [vmem:[%s1591_s3 + $0x8] sm:$0xff]  ;;  %v1302_v31 = vmov 0   ;;  %v1465_v33 = vld [vmem:[%s1591_s3 + $0x10] sm:$0xff]  ;;  %vm517_vm5 = vcmask 470016  }
  0x19   : > { %v1027_v1 = vld [vmem:[%s255_s14 + $0x8] sm:$0xf]  ;;  %v259_v2 = vld [vmem:[%s255_s14] sm:$0xf]  ;;  %v1028_v3 = vld [vmem:[%s255_s14 + $0xc] sm:$0xf]  ;;  %1210 = vset.pattern.permute.xlu1 %v1302_v31  ;;  %1209 = vset.pattern.permute.xlu0 %v1302_v31 }
  0x1a   : > { %320 = vrot.lane.b32.xlu1 %v1027_v1, %s1293_s15  ;;  %282 = vrot.lane.b32.xlu0 %v259_v2, %s1294_s16  ;;  %v260_v4 = vld [vmem:[%s255_s14 + $0x4] sm:$0xf]  ;;  %262 = vst.msk [vmem:[#allocation2] sm:$0xf] %vm261_vm0, %v259_v2  ;;  %v1477_v35 = vld [vmem:[%s1591_s3 + $0x18] sm:$0xff]  ;;  %vm624_vm6 = vcmask 1043456  }
  0x1b   : > { %263 = vst.msk [vmem:[#allocation2 + $0x4] sm:$0xf] %vm261_vm0, %v260_v4  ;;  %v1225_v29 = vld [vmem:[%s1590_s2] sm:$0xff]   ;;  %v1483_v36 = vld [vmem:[%s1592_s4 + $0x8] sm:$0xff]  ;;  %vm912_vm10 = vcmask 457960  }
  0x1c   : > { %1144 = vmatprep.mubr.msk.bf16.mxu1 %vm605_vm4, %v1225_v29  ;;  %v1458_v32 = vld [vmem:[%s1591_s3] sm:$0xff] }
  0x1d   : > { %v1470_v34 = vld [vmem:[%s1592_s4] sm:$0xff] }
  0x1e   : > { %322 = vrot.lane.b32.xlu1 %v1028_v3, %s1293_s15  ;;  %284 = vrot.lane.b32.xlu0 %v260_v4, %s1294_s16 }
  0x22   : > { %276 = vrot.lane.b32.xlu1 %v260_v4, %s1296_s17  ;;  %274 = vrot.lane.b32.xlu0 %v259_v2, %s1296_s17 }
  0x26   : > { %314 = vrot.lane.b32.xlu1 %v1028_v3, %s1297_s18  ;;  %312 = vrot.lane.b32.xlu0 %v1027_v1, %s1297_s18 }
  0x2a   : > { %268 = vrot.lane.b32.xlu1 %v260_v4, %s1298_s19  ;;  %266 = vrot.lane.b32.xlu0 %v259_v2, %s1298_s19 }
  0x2e   : > { %306 = vrot.lane.b32.xlu1 %v1028_v3, %s1299_s20  ;;  %304 = vrot.lane.b32.xlu0 %v1027_v1, %s1299_s20 }
  0x32   : > { %297 = vrot.lane.b32.xlu1 %v1028_v3, %s1301_s21  ;;  %295 = vrot.lane.b32.xlu0 %v1027_v1, %s1301_s21  ;;  %s1085_s21 = sshll.u32 %s1366_s5, 5  ;;  %s1304_s5 = smov [#allocation5]  }
  0x33   : > { %s1546_s29 = scalar_lea.hbm %s1594_s6, %s1085_s21  ;;  %s1235_s11 = sshll.u32 %s1304_s5, 4  ;;  %s1236_s11 = int_to_ptr.vmem [resolvable:$false] %s1235_s11 }
  0x34   : > { %s1237_s12 = scalar_lea.vmem %s1236_s11, 64 }
  0x36   : > { %855 = vperm.xlu1 %1210, %v1453_v30   ;;  %850 = vperm.xlu0 %1209, %v1458_v32  }
  0x3a   : > { %860 = vperm.xlu1 %1210, %v1465_v33   ;;  %890 = vperm.xlu0 %1209, %v1470_v34  }
  0x3e   : > { %865 = vperm.xlu1 %1210, %v1477_v35  }
  0x42   : > { %895 = vperm.xlu1 %1210, %v1483_v36  }
  0x8c   : > { %v321_v6 = vpop.permute.xlu1 %320  ;;  %v283_v7 = vpop.permute.xlu0 %282 }
  0x8d   : > { %288 = vst.msk [vmem:[#allocation2 + $0x18] sm:$0xf] %vm261_vm0, %v283_v7 }
  0x8e   : > { %326 = vst.msk [vmem:[#allocation2 + $0x18] sm:$0xf] %vm301_vm2, %v321_v6 }
  0x90   : > { %v323_v8 = vpop.permute.xlu1 %322  ;;  %v285_v9 = vpop.permute.xlu0 %284 }
  0x91   : > { %289 = vst.msk [vmem:[#allocation2 + $0x1c] sm:$0xf] %vm261_vm0, %v285_v9  ;;  %v1227_v9 = vld [vmem:[%s1590_s2 + $0x10] sm:$0xff]  }
  0x92   : > { %327 = vst.msk [vmem:[#allocation2 + $0x1c] sm:$0xf] %vm301_vm2, %v323_v8  ;;  %v1226_v8 = vld [vmem:[%s1590_s2 + $0x8] sm:$0xff]  }
  0x94   : > { %v277_v10 = vpop.permute.xlu1 %276  ;;  %v275_v11 = vpop.permute.xlu0 %274 }
  0x95   : > { %281 = vst.msk [vmem:[#allocation2 + $0x14] sm:$0xf] %vm261_vm0, %v277_v10  ;;  %280 = vst.msk [vmem:[#allocation2 + $0x10] sm:$0xf] %vm261_vm0, %v275_v11  ;;  %v1228_v10 = vld [vmem:[%s1590_s2 + $0x18] sm:$0xff]   ;;  %v1229_v11 = vld [vmem:[%s1590_s2 + $0x20] sm:$0xff]  }
  0x98   : > { %v315_v12 = vpop.permute.xlu1 %314  ;;  %v313_v13 = vpop.permute.xlu0 %312 }
  0x99   : > { %319 = vst.msk [vmem:[#allocation2 + $0x14] sm:$0xf] %vm301_vm2, %v315_v12  ;;  %318 = vst.msk [vmem:[#allocation2 + $0x10] sm:$0xf] %vm301_vm2, %v313_v13  ;;  %v1211_v14 = vld [vmem:[#allocation2 + $0x18] sm:$0xff]   ;;  %v1230_v12 = vld [vmem:[%s1590_s2 + $0x28] sm:$0xff]  }
  0x9a   : > { %1107 = vmatpush3.bf16.msra.mxu0 %v1211_v14 }
  0x9b   : > { %1108 = vmatprep.subr.bf16.mxu0 %v1295_v5 }
  0x9c   : > { %v269_v15 = vpop.permute.xlu1 %268  ;;  %v267_v16 = vpop.permute.xlu0 %266 }
  0x9d   : > { %273 = vst.msk [vmem:[#allocation2 + $0xc] sm:$0xf] %vm261_vm0, %v269_v15  ;;  %272 = vst.msk [vmem:[#allocation2 + $0x8] sm:$0xf] %vm261_vm0, %v267_v16  ;;  %vm817_vm0 = vcmask 220160  }
  0xa0   : > { %v307_v17 = vpop.permute.xlu1 %306  ;;  %v305_v18 = vpop.permute.xlu0 %304  ;;  %v1212_v19 = vld [vmem:[#allocation2 + $0x10] sm:$0xff]  }
  0xa1   : > { %311 = vst.msk [vmem:[#allocation2 + $0xc] sm:$0xf] %vm301_vm2, %v307_v17  ;;  %310 = vst.msk [vmem:[#allocation2 + $0x8] sm:$0xf] %vm301_vm2, %v305_v18  ;;  %1109 = vmatpush3.bf16.msra.mxu0 %v1212_v19 }
  0xa2   : > { %1110 = vmatprep.subr.bf16.mxu0 %v1295_v5 }
  0xa4   : > { %v298_v20 = vpop.permute.xlu1 %297  ;;  %v296_v21 = vpop.permute.xlu0 %295 }
  0xa5   : > { %303 = vst.msk [vmem:[#allocation2 + $0x4] sm:$0xf] %vm301_vm2, %v298_v20  ;;  %302 = vst.msk [vmem:[#allocation2] sm:$0xf] %vm301_vm2, %v296_v21 }
  0xa8   : > { %v1213_v22 = vld [vmem:[#allocation2 + $0x8] sm:$0xff]  }
  0xa9   : > { %1111 = vmatpush3.bf16.msra.mxu0 %v1213_v22 }
  0xaa   : > { %1112 = vmatprep.subr.bf16.mxu0 %v1295_v5 }
  0xac   : > { %v1214_v23 = vld [vmem:[#allocation2] sm:$0xff]  }
  0xad   : > { %1113 = vmatpush3.bf16.msra.mxu0 %v1214_v23 }
  0xb0   : > { %1115 = vmatmul.mubr.msk.bf16.vlgmr.msra.gmra.mxu0 %vm392_vm3, %v1215_v24 }
  0xb1   : > { %1118 = vmatprep.mubr.msk.bf16.mxu0 %vm1300_vm1, %v1295_v5  ;;  %v856_v29 = vpop.permute.xlu1 %855 }
  0xb5   : > { %v861_v31 = vpop.permute.xlu1 %860 }
  0xb8   : > { %1119 = vmatmul.mubr.msk.bf16.gmra.mxu0 %vm392_vm3, %v1216_v25  ;;  %v886_v25 = vld [vmem:[%s1592_s4 + $0x10] sm:$0xff] }
  0xb9   : > { %1122 = vmatprep.mubr.msk.bf16.mxu0 %vm1300_vm1, %v1295_v5 }
  0xc0   : > { %1123 = vmatmul.mubr.msk.bf16.gmra.mxu0 %vm392_vm3, %v1217_v26  ;;  %v926_v26 = vld [vmem:[#allocation4] sm:$0x1] }
  0xc1   : > { %1126 = vmatprep.mubr.msk.bf16.mxu0 %vm1300_vm1, %v1295_v5 }
  0xc8   : > { %1127 = vmatmul.mubr.msk.bf16.gmra.mxu0 %vm392_vm3, %v1218_v27  ;;  %v887_v27 = vld [vmem:[%s1592_s4 + $0x18] sm:$0xff] }
  0xc9   : > { %1130 = vmatprep.mubr.msk.bf16.mxu0 %vm1300_vm1, %v1295_v5  ;;  %vm842_vm1 = vcmask 212992  }
  0xd0   : > { %1131 = vmatmul.mubr.msk.bf16.gmra.mxu0 %vm392_vm3, %v1219_v28  ;;  %v831_v28 = vld [vmem:[#allocation4] sm:$0x1] }
 0x170   : > { %v442_v37 = vpop.f32.mrf.mxu0 }
 0x171   : > { %v1076_v38 = vpack.c.bf16 %v442_v37, %v442_v37  ;;  %v851_v37 = vpop.permute.xlu0 %850 }
 0x172   : > { %v1116_v39 = vpop.f32.mrf.mxu0 }
 0x173   : > { %518 = vst.msk [vmem:[#allocation3] sm:$0xf] %vm517_vm5, %v1076_v38  ;;  %v866_v38 = vpop.permute.xlu1 %865 }
 0x174   : > { %v445_v40 = vpop.f32.mrf.mxu0 }
 0x175   : > { %v1077_v41 = vpack.c.bf16 %v445_v40, %v445_v40  ;;  %v891_v39 = vpop.permute.xlu0 %890 }
 0x176   : > { %v1117_v42 = vpop.f32.mrf.mxu0 }
 0x177   : > { %519 = vst.msk [vmem:[#allocation3 + $0x4] sm:$0xf] %vm517_vm5, %v1077_v41 }
 0x178   : > { %v450_v43 = vpop.f32.mrf.mxu0 }
 0x179   : > { %v1078_v44 = vpack.c.bf16 %v450_v43, %v450_v43 }
 0x17a   : > { %v1120_v45 = vpop.f32.mrf.mxu0 }
 0x17b   : > { %520 = vst.msk [vmem:[#allocation3 + $0x8] sm:$0xf] %vm517_vm5, %v1078_v44 }
 0x17c   : > { %v453_v46 = vpop.f32.mrf.mxu0 }
 0x17d   : > { %v1079_v47 = vpack.c.bf16 %v453_v46, %v453_v46 }
 0x17e   : > { %v1121_v48 = vpop.f32.mrf.mxu0  ;;  %v1224_v7 = vld [vmem:[#allocation3] sm:$0xff]  }
 0x17f   : > { %521 = vst.msk [vmem:[#allocation3 + $0xc] sm:$0xf] %vm517_vm5, %v1079_v47 }
 0x180   : > { %v458_v49 = vpop.f32.mrf.mxu0 }
 0x181   : > { %v1080_v50 = vpack.c.bf16 %v458_v49, %v458_v49 }
 0x182   : > { %v1124_v51 = vpop.f32.mrf.mxu0 }
 0x183   : > { %522 = vst.msk [vmem:[#allocation3 + $0x10] sm:$0xf] %vm517_vm5, %v1080_v50 }
 0x184   : > { %v461_v52 = vpop.f32.mrf.mxu0 }
 0x185   : > { %v1081_v53 = vpack.c.bf16 %v461_v52, %v461_v52 }
 0x186   : > { %v1125_v54 = vpop.f32.mrf.mxu0  ;;  %v1223_v6 = vld [vmem:[#allocation3 + $0x8] sm:$0xff]  }
 0x187   : > { %523 = vst.msk [vmem:[#allocation3 + $0x14] sm:$0xf] %vm517_vm5, %v1081_v53 }
 0x188   : > { %v466_v55 = vpop.f32.mrf.mxu0 }
 0x189   : > { %v1082_v56 = vpack.c.bf16 %v466_v55, %v466_v55 }
 0x18a   : > { %v1128_v57 = vpop.f32.mrf.mxu0 }
 0x18b   : > { %524 = vst.msk [vmem:[#allocation3 + $0x18] sm:$0xf] %vm517_vm5, %v1082_v56 }
 0x18c   : > { %v469_v58 = vpop.f32.mrf.mxu0 }
 0x18d   : > { %v1083_v59 = vpack.c.bf16 %v469_v58, %v469_v58 }
 0x18e   : > { %v1129_v60 = vpop.f32.mrf.mxu0  ;;  %v1222_v5 = vld [vmem:[#allocation3 + $0x10] sm:$0xff]  }
 0x18f   : > { %525 = vst.msk [vmem:[#allocation3 + $0x1c] sm:$0xf] %vm517_vm5, %v1083_v59 }
 0x190   : > { %v474_v61 = vpop.f32.mrf.mxu0 }
 0x191   : > { %v1084_v62 = vpack.c.bf16 %v474_v61, %v474_v61 }
 0x192   : > { %v1132_v63 = vpop.f32.mrf.mxu0 }
 0x193   : > { %526 = vst.msk [vmem:[#allocation3 + $0x20] sm:$0xf] %vm517_vm5, %v1084_v62 }
 0x194   : > { %v477_v0 = vpop.f32.mrf.mxu0 }
 0x196   : > { %v1133_v1 = vpop.f32.mrf.mxu0  ;;  %v1221_v4 = vld [vmem:[#allocation3 + $0x18] sm:$0xff]  }
 0x19a   : > { %v1220_v2 = vld [vmem:[#allocation3 + $0x20] ss:$0 sps:$4 sm:$0xff]  }
 0x19b   : > { %1156 = vmatprep.subr.msk.bf16.mxu1 %vm624_vm6, %v1220_v2  ;;  %v626_v3 = vsel %vm624_vm6, %v1220_v2, 0 }
 0x19c   : > { %1135 = vmatpush3.bf16.msra.mxu1 %v626_v3 }
 0x19d   : > { %1136 = vmatprep.subr.bf16.mxu1 %v1221_v4 }
 0x1a0   : > { %1137 = vmatpush3.bf16.msra.mxu1 %v1221_v4 }
 0x1a1   : > { %1138 = vmatprep.subr.bf16.mxu1 %v1222_v5 }
 0x1a4   : > { %1139 = vmatpush3.bf16.msra.mxu1 %v1222_v5 }
 0x1a5   : > { %1140 = vmatprep.subr.bf16.mxu1 %v1223_v6 }
 0x1a8   : > { %1141 = vmatpush3.bf16.msra.mxu1 %v1223_v6 }
 0x1a9   : > { %1142 = vmatprep.subr.bf16.mxu1 %v1224_v7 }
 0x1ac   : > { %1143 = vmatpush3.bf16.msra.mxu1 %v1224_v7 }
 0x1af   : > { %1145 = vmatmul.mubr.msk.bf16.vlgmr.msra.gmra.mxu1 %vm605_vm4, %v1226_v8 }
 0x1b0   : > { %1148 = vmatprep.mubr.msk.bf16.mxu1 %vm605_vm4, %v1227_v9 }
 0x1b7   : > { %1149 = vmatmul.mubr.msk.bf16.gmra.mxu1 %vm605_vm4, %v1228_v10 }
 0x1b8   : > { %1152 = vmatprep.mubr.msk.bf16.mxu1 %vm605_vm4, %v1229_v11 }
 0x1bf   : > { %1153 = vmatmul.mubr.msk.bf16.gmra.mxu1 %vm605_vm4, %v1230_v12  ;;  %v837_v12 = vlaneseq }
 0x26f   : > { %v1146_v13 = vpop.f32.mrf.mxu1 }
 0x271   : > { %v662_v14 = vpop.f32.mrf.mxu1 }
 0x273   : > { %v1147_v15 = vpop.f32.mrf.mxu1 }
 0x275   : > { %v665_v16 = vpop.f32.mrf.mxu1 }
 0x277   : > { %v1150_v17 = vpop.f32.mrf.mxu1 }
 0x278   : > { %717 = vrot.lane.b32.xlu0 %v1150_v17, %s1298_s19 }
 0x279   : > { %v678_v18 = vpop.f32.mrf.mxu1 }
 0x27a   : > { %713 = vrot.lane.b32.xlu1 %v678_v18, %s1298_s19 }
 0x27b   : > { %v1151_v19 = vpop.f32.mrf.mxu1 }
 0x27c   : > { %719 = vrot.lane.b32.xlu0 %v1151_v19, %s1298_s19 }
 0x27d   : > { %v681_v20 = vpop.f32.mrf.mxu1 }
 0x27f   : > { %v1154_v21 = vpop.f32.mrf.mxu1 }
 0x280   : > { %715 = vrot.lane.b32.xlu0 %v681_v20, %s1298_s19  ;;  %737 = vrot.lane.b32.xlu1 %v1154_v21, %s1296_s17  ;;  %v838_v20 = vshrl.u32 %v837_v12, 7  ;;  %s247_s19 = sand.u32 1, %s1283_s24  }
 0x281   : > { %v694_v22 = vpop.f32.mrf.mxu1  ;;  %s1023_s16 = sshll.u32 %s247_s19, 1  ;;  %s1548_s30 = scalar_lea.sflag [#allocation6], %s247_s19 }
 0x282   : > { %s249_s18 = scalar_lea.vmem [#allocation5], %s1023_s16 }
 0x283   : > { %v1155_v23 = vpop.f32.mrf.mxu1  ;;  %s957_s20 = sshll.u32 %s249_s18, 4  ;;  %s1541_s20 = int_to_ptr.vmem [resolvable:$true] %s957_s20 }
 0x284   : > { %733 = vrot.lane.b32.xlu1 %v694_v22, %s1296_s17  ;;  %s1231_s10 = scalar_lea.vmem %s1541_s20, 32  ;;  %p1238_p0 = scmp.lt.s32.totalorder %s1541_s20, %s1236_s11 }
 0x285   : > { %v697_v24 = vpop.f32.mrf.mxu1  ;;  %p1232_p11 = scmp.ne.s32.totalorder %s1541_s20, %s1231_s10  ;;  %p1239_p1 = scmp.lt.s32.totalorder %s1237_s12, %s1231_s10 }
 0x286   : > { %735 = vrot.lane.b32.xlu0 %v697_v24, %s1296_s17 }
 0x287   : > { %p1233_p12 = pnand %p1232_p11, %p1383_p5  ;;  %p1240_p2 = por %p1239_p1, %p1238_p0 }
 0x288   : > { %900 = vperm.xlu1 %1210, %v886_v25  }
 0x289   : > { %p1234_p13 = pneg %p1233_p12 }
 0x28a   : > { %739 = vrot.lane.b32.xlu0 %v1155_v23, %s1296_s17  ;;  %s1303_s17 = smov 99  }
 0x28b   : > { %p1241_p3 = pnand %p1240_p2, %p1234_p13 }
 0x28c   : > { %929 = vperm.xlu1 %1210, %v926_v26  }
 0x28e   : > { %905 = vperm.xlu0 %1209, %v887_v27  }
 0x290   : > { %760 = vperm.xlu1 %1210, %v1453_v30   ;;  %v896_v30 = vpop.permute.xlu1 %895 }
 0x292   : > { %755 = vperm.xlu0 %1209, %v1458_v32  }
 0x294   : > { %770 = vperm.xlu1 %1210, %v1477_v35  }
 0x296   : > { %765 = vperm.xlu0 %1209, %v1465_v33  }
 0x298   : > { %800 = vperm.xlu1 %1210, %v1483_v36  }
 0x29a   : > { %795 = vperm.xlu0 %1209, %v1470_v34  }
 0x29c   : > { %810 = vperm.xlu1 %1210, %v887_v27  }
 0x29e   : > { %805 = vperm.xlu0 %1209, %v886_v25  }
 0x2a2   : > { %834 = vperm.xlu0 %1209, %v831_v28  }
 0x2ea   : > { %v718_v40 = vpop.permute.xlu0 %717 }
 0x2eb   : > { %v727_v33 = vadd.f32 %v1146_v13, %v718_v40 }
 0x2ec   : > { %v714_v32 = vpop.permute.xlu1 %713 }
 0x2ed   : > { %v725_v43 = vadd.f32 %v714_v32, %v662_v14 }
 0x2ee   : > { %v720_v41 = vpop.permute.xlu0 %719 }
 0x2ef   : > { %v728_v49 = vadd.f32 %v1147_v15, %v720_v41 }
 0x2f2   : > { %v738_v35 = vpop.permute.xlu1 %737  ;;  %v716_v42 = vpop.permute.xlu0 %715 }
 0x2f3   : > { %v726_v44 = vadd.f32 %v716_v42, %v665_v16  ;;  %v747_v34 = vadd.f32 %v738_v35, %v727_v33 }
 0x2f5   : > { %v870_v50 = vadd.f32 %v861_v31, %v747_v34 }
 0x2f6   : > { %v734_v36 = vpop.permute.xlu1 %733 }
 0x2f7   : > { %v745_v45 = vadd.f32 %v734_v36, %v725_v43  ;;  %v878_v57 = vmul.f32 0.2, %v870_v50  ;;  %vm874_vm9 = vcmp.gt.f32.partialorder %v870_v50, 0.0 }
 0x2f8   : > { %v736_v46 = vpop.permute.xlu0 %735 }
 0x2f9   : > { %v868_v47 = vadd.f32 %v851_v37, %v745_v45  ;;  %v746_v48 = vadd.f32 %v736_v46, %v726_v44  ;;  %v882_v61 = vsel %vm874_vm9, %v870_v50, %v878_v57 }
 0x2fb   : > { %v869_v51 = vadd.f32 %v856_v29, %v746_v48  ;;  %v876_v53 = vmul.f32 0.2, %v868_v47  ;;  %vm872_vm8 = vcmp.gt.f32.partialorder %v868_v47, 0.0  ;;  %v839_v29 = vsub.s32 0, %v838_v20 }
 0x2fc   : > { %v740_v52 = vpop.permute.xlu0 %739 }
 0x2fd   : > { %vm873_vm7 = vcmp.gt.f32.partialorder %v869_v51, 0.0  ;;  %v877_v54 = vmul.f32 0.2, %v869_v51  ;;  %v748_v55 = vadd.f32 %v740_v52, %v728_v49  ;;  %v880_v58 = vsel %vm872_vm8, %v868_v47, %v876_v53 }
 0x2fe   : > { %v908_v63 = vmul.f32 %v891_v39, %v880_v58 }
 0x2ff   : > { %v881_v56 = vsel %vm873_vm7, %v869_v51, %v877_v54  ;;  %v871_v59 = vadd.f32 %v866_v38, %v748_v55 }
 0x300   : > { %v909_v60 = vmul.f32 %v896_v30, %v881_v56  ;;  %v913_v4 = vsel %vm912_vm10, %v908_v63, 0.0 }
 0x301   : > { %v879_v1 = vmul.f32 0.2, %v871_v59  ;;  %vm875_vm11 = vcmp.gt.f32.partialorder %v871_v59, 0.0 }
 0x302   : > { %v914_v2 = vsel %vm912_vm10, %v909_v60, 0.0 }
 0x303   : > { %v901_v62 = vpop.permute.xlu1 %900  ;;  %v915_v6 = vadd.f32 %v914_v2, %v913_v4  ;;  %v883_v7 = vsel %vm875_vm11, %v871_v59, %v879_v1 }
 0x304   : > { %v910_v0 = vmul.f32 %v901_v62, %v882_v61 }
 0x306   : > { %v916_v5 = vsel %vm912_vm10, %v910_v0, 0.0 }
 0x307   : > { %v930_v3 = vpop.permute.xlu1 %929  ;;  %v917_v10 = vadd.f32 %v916_v5, %v915_v6 }
 0x308   : > { %v935_v43 = vrot.slane %v930_v3, %v839_v29 }
 0x309   : > { %v906_v8 = vpop.permute.xlu0 %905 }
 0x30a   : > { %v911_v9 = vmul.f32 %v906_v8, %v883_v7 }
 0x30b   : > { %v761_v11 = vpop.permute.xlu1 %760 }
 0x30c   : > { %v918_v13 = vsel %vm912_vm10, %v911_v9, 0.0  ;;  %v774_v14 = vadd.f32 %v761_v11, %v746_v48 }
 0x30d   : > { %v919_v15 = vadd.f32 %v918_v13, %v917_v10  ;;  %v756_v16 = vpop.permute.xlu0 %755 }
 0x30e   : > { %v773_v17 = vadd.f32 %v756_v16, %v745_v45  ;;  %v782_v21 = vmul.f32 0.2, %v774_v14  ;;  %vm778_vm12 = vcmp.gt.f32.partialorder %v774_v14, 0.0 }
 0x30f   : > { %v920_v18 = vrot.slane %v919_v15, 4  ;;  %v771_v19 = vpop.permute.xlu1 %770 }
 0x310   : > { %v781_v23 = vmul.f32 0.2, %v773_v17  ;;  %v776_v24 = vadd.f32 %v771_v19, %v748_v55  ;;  %vm777_vm13 = vcmp.gt.f32.partialorder %v773_v17, 0.0  ;;  %v786_v31 = vsel %vm778_vm12, %v774_v14, %v782_v21 }
 0x311   : > { %v921_v22 = vadd.f32 %v920_v18, %v919_v15  ;;  %v766_v25 = vpop.permute.xlu0 %765 }
 0x312   : > { %v775_v26 = vadd.f32 %v766_v25, %v747_v34  ;;  %v784_v38 = vmul.f32 0.2, %v776_v24  ;;  %v785_v30 = vsel %vm777_vm13, %v773_v17, %v781_v23  ;;  %vm780_vm14 = vcmp.gt.f32.partialorder %v776_v24, 0.0 }
 0x313   : > { %v922_v27 = vrot.slane %v921_v22, 2  ;;  %v801_v28 = vpop.permute.xlu1 %800 }
 0x314   : > { %v783_v39 = vmul.f32 0.2, %v775_v26  ;;  %v814_v32 = vmul.f32 %v801_v28, %v786_v31  ;;  %vm779_vm15 = vcmp.gt.f32.partialorder %v775_v26, 0.0  ;;  %v788_v36 = vsel %vm780_vm14, %v776_v24, %v784_v38 }
 0x315   : > { %v923_v37 = vadd.f32 %v922_v27, %v921_v22  ;;  %v796_v40 = vpop.permute.xlu0 %795 }
 0x316   : > { %v813_v41 = vmul.f32 %v796_v40, %v785_v30  ;;  %v787_v44 = vsel %vm779_vm15, %v775_v26, %v783_v39  ;;  %v819_v46 = vsel %vm817_vm0, %v814_v32, 0.0 }
 0x317   : > { %v811_v35 = vpop.permute.xlu1 %810  ;;  %v924_v42 = vrot.slane %v923_v37, 1 }
 0x318   : > { %v818_v33 = vsel %vm817_vm0, %v813_v41, 0.0  ;;  %v816_v47 = vmul.f32 %v811_v35, %v788_v36 }
 0x319   : > { %v806_v34 = vpop.permute.xlu0 %805  ;;  %v925_v45 = vadd.f32 %v924_v42, %v923_v37  ;;  %v820_v49 = vadd.f32 %v819_v46, %v818_v33 }
 0x31a   : > { %v815_v48 = vmul.f32 %v806_v34, %v787_v44  ;;  %v823_v53 = vsel %vm817_vm0, %v816_v47, 0.0 }
 0x31b   : > { %v936_v50 = vadd.f32 %v935_v43, %v925_v45 }
 0x31c   : > { %v821_v51 = vsel %vm817_vm0, %v815_v48, 0.0 }
 0x31d   : > { %v822_v52 = vadd.f32 %v821_v51, %v820_v49  ;;  %938 = vrot.lane.b32.xlu1 %v936_v50, %s1303_s17  ;;  %v835_v59 = vpop.permute.xlu0 %834 }
 0x31e   : > { %v840_v62 = vrot.slane %v835_v59, %v839_v29 }
 0x31f   : > { %v824_v54 = vadd.f32 %v823_v53, %v822_v52 }
 0x321   : > { %v825_v55 = vrot.slane %v824_v54, 4 }
 0x323   : > { %v826_v56 = vadd.f32 %v825_v55, %v824_v54 }
 0x325   : > { %v827_v57 = vrot.slane %v826_v56, 2 }
 0x327   : > { %v828_v58 = vadd.f32 %v827_v57, %v826_v56 }
 0x329   : > { %v829_v60 = vrot.slane %v828_v58, 1 }
 0x32b   : > { %v830_v61 = vadd.f32 %v829_v60, %v828_v58 }
 0x32d   : > { %v841_v63 = vadd.f32 %v840_v62, %v830_v61 }
 0x32f   : > { %843 = vst.msk [vmem:[%s249_s18] sm:$0x1] %vm842_vm1, %v841_v63 }
 0x38f   : > { %v939_v0 = vpop.permute.xlu1 %938 }
 0x390   : > { %1069 = vst.msk [vmem:[%s249_s18 + $0x1] sm:$0x1] %vm842_vm1, %v939_v0 }
 0x391   : > { %1244 = shalt.err (!%p1241_p3)
}
 0x392   : > { %s1245_s13 = scalar_lea.hbm %s1546_s29, 32  ;;  %s1249_s17 = scalar_lea.hbm %s1594_s6, 64 }
 0x393   : > { %p1246_p4 = scmp.ne.s32.totalorder %s1546_s29, %s1245_s13  ;;  %p1250_p9 = scmp.lt.s32.totalorder %s1546_s29, %s1594_s6 }
 0x394   : > { %p1251_p10 = scmp.lt.s32.totalorder %s1249_s17, %s1245_s13 }
 0x395   : > { %p1247_p7 = pnand %p1246_p4, %p1383_p5 }
 0x396   : > { %p1252_p11 = por %p1251_p10, %p1250_p9 }
 0x397   : > { %p1248_p8 = pneg %p1247_p7 }
 0x399   : > { %p1253_p12 = pnand %p1252_p11, %p1248_p8 }
 0x39b   : > { %1256 = shalt.err (!%p1253_p12)
}
 0x39c   : > { %s1305_s18 = smov 16   ;;  %s1306_s21 = smov 1  }
 0x39d   : > { %1157 = dma.vmem_to_hbm [thread:$0]  (%p1383_p5), %s1541_s20, 32, %s1546_s29, %s1548_s30, %s1305_s18, %s1305_s18, %s1306_s21  }
 0x39e PF: > { %p1163_p13 = scmp.ge.s32.totalorder %s1291_s26, 2  ;;  %s972_s22 = sand.u32 1, %s1279_s23  }
 0x39f   : > { %s973_s27 = scalar_lea.sflag [#allocation6], %s972_s22 }
 0x3a0   : > { %p1160_p0 = pnand %p1163_p13, %p1387_p6 }
 0x3a2   : > { %p1161_p1 = pneg %p1160_p0 }
 0x3a4   : > { %1274 = dma.done.wait (%p1161_p1), %s973_s27, 32  }
 0x3a5   : > { %1276 = vsyncadd (%p1161_p1), %s973_s27, 4294967264  ;;  %p18_p2 = scmp.ge.s32.totalorder %s1370_s28, 4   ;;  %s1597_s23 = smov %s1283_s24 }
 0x3a6   : > { %s1598_s24 = smov %s1287_s25  ;;  %s1599_s25 = smov %s1381_s7 }
 0x3a7   : > { %s1600_s26 = smov %s1370_s28  ;;  %20 = sbr.rel (!%p18_p2) target bundleno = 6 (0x6), region = 81 }
 0x3ac   :  { %978 = vsyncpa [#allocation6], 1 }
 0x3ad   :  { %980 = vsyncpa [#allocation6 + $0x1], 1 }

</bundles_post_ra>
